<compile_context>
chip_gen: v7x
topology: tpu7x:2x2x1
jax: 0.10.0
libtpu: 0.0.40
codegen_flags: <defaults>
</compile_context>

<pallas_src>
import jax
import jax.numpy as jnp
from jax import lax
from jax.experimental import pallas as pl
from jax.experimental.pallas import tpu as pltpu


def _online_softmax_update(s, v, m_scr, l_scr, acc_scr):
    """One flash-attention online-softmax update with scores s (bt, bt) and values v."""
    m_prev = m_scr[...]
    m_new = jnp.maximum(m_prev, jnp.max(s, axis=-1, keepdims=True))
    alpha = jnp.exp(m_prev - m_new)
    p = jnp.exp(s - m_new)
    l_scr[...] = alpha * l_scr[...] + jnp.sum(p, axis=-1, keepdims=True)
    acc_scr[...] = alpha * acc_scr[...] + jnp.dot(
        p.astype(v.dtype), v, preferred_element_type=jnp.float32)
    m_scr[...] = m_new


def _flash_causal_kernel(qi_of_ref, kv_of_ref, q_ref, k_ref, v_ref, o_ref,
                         m_scr, l_scr, acc_scr):
    """One (batch, pair) grid step of causal flash attention on pre-projected Q/K/V.

    qi_of_ref / kv_of_ref: (n_pairs,) int32 SMEM schedules (scalar prefetch).
    q_ref:  (bt, dpo)  query tile for row-block qi_of[p]   (scale already folded in)
    k_ref:  (bt, dpo)  key   tile for col-block kv_of[p]
    v_ref:  (bt, dpo)  value tile for col-block kv_of[p]
    o_ref:  (bt, dpo)  lane-dense output tile (real d_out sliced by the wrapper)
    """
    p_idx = pl.program_id(1)
    qi = qi_of_ref[p_idx]
    kv = kv_of_ref[p_idx]
    bt = q_ref.shape[0]

    @pl.when(kv == 0)
    def _init():
        m_scr[...] = jnp.full_like(m_scr, -jnp.inf)
        l_scr[...] = jnp.zeros_like(l_scr)
        acc_scr[...] = jnp.zeros_like(acc_scr)

    # scores (bt, bt): contract the head dim directly, no explicit k.T transpose.
    s = lax.dot_general(q_ref[...], k_ref[...], (((1,), (1,)), ((), ())),
                        preferred_element_type=jnp.float32)
    v = v_ref[...]

    @pl.when(kv < qi)  # strictly-below-diagonal tile: never masked -> fast path
    def _off_diag():
        _online_softmax_update(s, v, m_scr, l_scr, acc_scr)

    @pl.when(kv == qi)  # diagonal tile: local causal mask, then finalize (it's the last kv step)
    def _diag_and_finalize():
        tri = (lax.broadcasted_iota(jnp.int32, (bt, bt), 1)
               > lax.broadcasted_iota(jnp.int32, (bt, bt), 0))
        _online_softmax_update(jnp.where(tri, -jnp.inf, s), v, m_scr, l_scr, acc_scr)
        # Deferred normalization: EUP approx reciprocal + one Newton step, on (bt, dpo).
        l = l_scr[...]
        inv_l = pl.reciprocal(l, approx=True)
        inv_l = inv_l * (2.0 - l * inv_l)
        o_ref[...] = (acc_scr[...] * inv_l).astype(o_ref.dtype)


def _round_up(n, m):
    return ((n + m - 1) // m) * m


def causal_attention_with_buffer(x, w_query, w_key, w_value, *,
                                 block_t=256, matmul_dtype=None, out_dtype=None):
    """Forward pass of CausalAttentionWithBuffer (eval mode / dropout=0).

    x:   (B, T, d_in) activations.
    w_*: (d_out, d_in) -- PyTorch nn.Linear weight layout, no bias.
    matmul_dtype: dtype for the MXU inputs (bf16 recommended on v6e/v7x); f32 accumulation
                  and f32 softmax math are kept regardless.
    Returns (B, T, d_out) context vectors in out_dtype (default float32).
    """
    B, T, d_in = x.shape
    d_out = w_query.shape[0]
    compute_dtype = jnp.dtype(matmul_dtype) if matmul_dtype is not None else jnp.dtype(x.dtype)
    out_dt = jnp.dtype(out_dtype) if out_dtype is not None else jnp.dtype(jnp.float32)

    # Lane-dense padded head dim and dtype-aware sequence tiling
    # (sublane multiple: 8 for 4-byte, 16 for bf16, 32 for int8/fp8).
    dpo = _round_up(d_out, 128)
    sub = max(32 // max(1, compute_dtype.itemsize), 32 // max(1, out_dt.itemsize))
    sub = max(sub, 8)
    bt = _round_up(max(sub, min(block_t, _round_up(T, sub))), sub)
    t_pad = _round_up(T, bt)
    n_t = t_pad // bt

    # Pre-transpose weights to (d_in, d_out); fold 1/sqrt(d_out) into W_query; zero-pad
    # the head dim to dpo; fuse all three projections into one (d_in, 3*dpo) matrix.
    scale = 1.0 / (float(d_out) ** 0.5)
    pad_w = ((0, 0), (0, dpo - d_out))
    wq = jnp.pad(jnp.asarray(w_query, jnp.float32).T * scale, pad_w)
    wk = jnp.pad(jnp.asarray(w_key, jnp.float32).T, pad_w)
    wv = jnp.pad(jnp.asarray(w_value, jnp.float32).T, pad_w)
    w_all = jnp.concatenate([wq, wk, wv], axis=1).astype(compute_dtype)   # (d_in, 3*dpo)

    xp = jnp.pad(x, ((0, 0), (0, t_pad - T), (0, 0))).astype(compute_dtype)

    # Hoisted fused Q/K/V projection: one matmul, O(T * d_in * 3*dpo) total instead of the
    # previous O(T^2/bt * d_in * 2*dpo) in-kernel re-projection. f32 accumulation.
    qkv = jnp.einsum("btd,de->bte", xp, w_all,
                     preferred_element_type=jnp.float32).astype(compute_dtype)
    q = qkv[..., :dpo]
    k = qkv[..., dpo:2 * dpo]
    v = qkv[..., 2 * dpo:]

    # Triangular (qi, kv) schedule: only kv <= qi pairs exist; kv increases within each qi
    # group so kv == 0 is the init step and kv == qi is the finalize step.
    pairs = [(qi, kv) for qi in range(n_t) for kv in range(qi + 1)]
    qi_of = jnp.asarray([pr[0] for pr in pairs], jnp.int32)
    kv_of = jnp.asarray([pr[1] for pr in pairs], jnp.int32)
    n_pairs = len(pairs)

    # Explicit VMEM budget: double-buffered q/k/v + output blocks plus f32 scratch,
    # with 2x headroom, clamped to [32 MiB, 64 MiB] (v7x physical VMEM is 64 MiB).
    vmem_bytes = (3 * 2 * bt * dpo * compute_dtype.itemsize
                  + 2 * bt * dpo * out_dt.itemsize
                  + (bt * dpo + 2 * bt) * 4)
    vmem_limit = int(min(max(2 * vmem_bytes, 32 * 1024 * 1024), 64 * 1024 * 1024))

    out = pl.pallas_call(
        _flash_causal_kernel,
        out_shape=jax.ShapeDtypeStruct((B, t_pad, dpo), out_dt),
        grid_spec=pltpu.PrefetchScalarGridSpec(
            num_scalar_prefetch=2,
            grid=(B, n_pairs),
            in_specs=[
                pl.BlockSpec((None, bt, dpo), lambda b, p, qi_of, kv_of: (b, qi_of[p], 0)),  # Q
                pl.BlockSpec((None, bt, dpo), lambda b, p, qi_of, kv_of: (b, kv_of[p], 0)),  # K
                pl.BlockSpec((None, bt, dpo), lambda b, p, qi_of, kv_of: (b, kv_of[p], 0)),  # V
            ],
            out_specs=pl.BlockSpec((None, bt, dpo), lambda b, p, qi_of, kv_of: (b, qi_of[p], 0)),
            scratch_shapes=[
                pltpu.VMEM((bt, 1), jnp.float32),     # running row max m
                pltpu.VMEM((bt, 1), jnp.float32),     # running softmax denom l
                pltpu.VMEM((bt, dpo), jnp.float32),   # unnormalized output accumulator
            ]),
        # Pair axis carries the kv reduction -> must stay "arbitrary"; batch is parallel
        # (for B==1 on v7x one TensorCore idles -- acceptable tradeoff for the triangular grid).
        compiler_params=pltpu.CompilerParams(
            dimension_semantics=("parallel", "arbitrary"),
            vmem_limit_bytes=vmem_limit),
    )(qi_of, kv_of, q, k, v)

    # TODO(synk): nn.Dropout with p>0 in training mode not implemented; dropout=0.0
    # (eval semantics) makes it the identity, matching the reference script.
    return out[:, :T, :d_out]


def _reference(x, w_query, w_key, w_value):
    """Pure-JAX reference mirroring the PyTorch forward."""
    q = x @ w_query.T
    k = x @ w_key.T
    v = x @ w_value.T
    scores = jnp.einsum("btd,bsd->bts", q, k)
    T = x.shape[1]
    mask = jnp.triu(jnp.ones((T, T), dtype=bool), k=1)
    scores = jnp.where(mask[None], -jnp.inf, scores)
    w = jax.nn.softmax(scores / jnp.sqrt(jnp.float32(k.shape[-1])), axis=-1)
    return w @ v


if __name__ == "__main__":
    # Inputs identical to the reference script: 6 tokens, d_in=3, batch of 2.
    inputs = jnp.array(
        [[0.43, 0.15, 0.89],
         [0.55, 0.87, 0.66],
         [0.57, 0.85, 0.64],
         [0.22, 0.58, 0.33],
         [0.77, 0.25, 0.10],
         [0.05, 0.80, 0.55]], dtype=jnp.float32)
    batch = jnp.stack((inputs, inputs), axis=0)        # (2, 6, 3)

    d_in = inputs.shape[1]     # 3
    d_out = 2

    # Deterministic parameter init (nn.Linear weight shape: (d_out, d_in), no bias).
    key = jax.random.PRNGKey(0)
    kq, kk, kv = jax.random.split(key, 3)
    bound = 1.0 / (d_in ** 0.5)
    w_query = jax.random.uniform(kq, (d_out, d_in), jnp.float32, -bound, bound)
    w_key = jax.random.uniform(kk, (d_out, d_in), jnp.float32, -bound, bound)
    w_value = jax.random.uniform(kv, (d_out, d_in), jnp.float32, -bound, bound)

    ref = _reference(batch, w_query, w_key, w_value)

    # f32 path (single tile).
    out = jax.block_until_ready(
        causal_attention_with_buffer(batch, w_query, w_key, w_value))
    assert out.shape == (2, 6, d_out), out.shape
    assert jnp.allclose(out, ref, atol=1e-5, rtol=1e-5)

    # bf16 MXU path (f32 accumulation / f32 softmax) -- looser tolerance.
    out_bf16 = jax.block_until_ready(
        causal_attention_with_buffer(batch, w_query, w_key, w_value,
                                     matmul_dtype=jnp.bfloat16))
    assert jnp.allclose(out_bf16, ref, atol=2e-2, rtol=2e-2)

    # Multi-tile triangular path with T padding: T=45, block_t=16 -> 3 q tiles, 6 pairs.
    kx2, kwq2, kwk2, kwv2 = jax.random.split(jax.random.PRNGKey(1), 4)
    B2, T2, din2, dout2 = 2, 45, 8, 16
    x2 = jax.random.normal(kx2, (B2, T2, din2), jnp.float32)
    wq2 = jax.random.normal(kwq2, (dout2, din2), jnp.float32) * 0.2
    wk2 = jax.random.normal(kwk2, (dout2, din2), jnp.float32) * 0.2
    wv2 = jax.random.normal(kwv2, (dout2, din2), jnp.float32) * 0.2
    ref2 = _reference(x2, wq2, wk2, wv2)

    out2 = jax.block_until_ready(
        causal_attention_with_buffer(x2, wq2, wk2, wv2, block_t=16))
    assert out2.shape == (B2, T2, dout2), out2.shape
    assert jnp.allclose(out2, ref2, atol=1e-4, rtol=1e-4)

    # Multi-tile bf16 path (bt rounded to the 16-sublane bf16 multiple): block_t=32 -> 2 q tiles.
    out2_bf16 = jax.block_until_ready(
        causal_attention_with_buffer(x2, wq2, wk2, wv2, block_t=32,
                                     matmul_dtype=jnp.bfloat16))
    assert out2_bf16.shape == (B2, T2, dout2), out2_bf16.shape
    assert jnp.allclose(out2_bf16, ref2, atol=5e-2, rtol=5e-2)

    print("KERNEL_OK")
</pallas_src>

<mosaic_0001>
module attributes {stable_mosaic.version = 11 : i64} {
  func.func @_flash_causal_kernel(%arg0: i32, %arg1: i32, %arg2: memref<1xi32, #tpu.memory_space<smem>>, %arg3: memref<1xi32, #tpu.memory_space<smem>>, %arg4: memref<1x8x128xf32, #tpu.memory_space<vmem>>, %arg5: memref<1x8x128xf32, #tpu.memory_space<vmem>>, %arg6: memref<1x8x128xf32, #tpu.memory_space<vmem>>, %arg7: memref<1x8x128xf32, #tpu.memory_space<vmem>>, %arg8: memref<8x1xf32, #tpu.memory_space<vmem>>, %arg9: memref<8x1xf32, #tpu.memory_space<vmem>>, %arg10: memref<8x128xf32, #tpu.memory_space<vmem>>) attributes {dimension_semantics = [#tpu.dimension_semantics<parallel>, #tpu.dimension_semantics<arbitrary>], iteration_bounds = array<i64: 2, 1>, scalar_prefetch = 2 : i64, scratch_operands = 3 : i64, tpu.core_type = #tpu.core_type<tc>, window_params = [{transform_indices = @transform_0, window_bounds = array<i64: 1, 8, 128>}, {transform_indices = @transform_1, window_bounds = array<i64: 1, 8, 128>}, {transform_indices = @transform_2, window_bounds = array<i64: 1, 8, 128>}, {transform_indices = @transform_3, window_bounds = array<i64: 1, 8, 128>}]} {
    %0 = arith.index_cast %arg1 : i32 to index
    %1 = memref.load %arg2[%0] : memref<1xi32, #tpu.memory_space<smem>>
    %2 = arith.index_cast %arg1 : i32 to index
    %3 = memref.load %arg3[%2] : memref<1xi32, #tpu.memory_space<smem>>
    %c0_i32 = arith.constant 0 : i32
    %4 = arith.cmpi eq, %3, %c0_i32 : i32
    %5 = arith.extui %4 : i1 to i32
    %c0_i32_0 = arith.constant 0 : i32
    %6 = arith.cmpi ne, %5, %c0_i32_0 : i32
    scf.if %6 {
      %cst_11 = arith.constant 0xFF800000 : f32
      %20 = vector.broadcast %cst_11 : f32 to vector<8x1xf32>
      %c0_12 = arith.constant 0 : index
      %c0_13 = arith.constant 0 : index
      %21 = vector.load %arg8[%c0_12, %c0_13] : memref<8x1xf32, #tpu.memory_space<vmem>>, vector<8x1xf32>
      tpu.vector_store %arg8[%c0_12, %c0_13], %20 {strides = array<i32>} : memref<8x1xf32, #tpu.memory_space<vmem>>, vector<8x1xf32>,
      %cst_14 = arith.constant 0.000000e+00 : f32
      %22 = vector.broadcast %cst_14 : f32 to vector<8x1xf32>
      %c0_15 = arith.constant 0 : index
      %c0_16 = arith.constant 0 : index
      %23 = vector.load %arg9[%c0_15, %c0_16] : memref<8x1xf32, #tpu.memory_space<vmem>>, vector<8x1xf32>
      tpu.vector_store %arg9[%c0_15, %c0_16], %22 {strides = array<i32>} : memref<8x1xf32, #tpu.memory_space<vmem>>, vector<8x1xf32>,
      %cst_17 = arith.constant 0.000000e+00 : f32
      %24 = vector.broadcast %cst_17 : f32 to vector<8x128xf32>
      %c0_18 = arith.constant 0 : index
      %c0_19 = arith.constant 0 : index
      %25 = vector.load %arg10[%c0_18, %c0_19] : memref<8x128xf32, #tpu.memory_space<vmem>>, vector<8x128xf32>
      tpu.vector_store %arg10[%c0_18, %c0_19], %24 {strides = array<i32>} : memref<8x128xf32, #tpu.memory_space<vmem>>, vector<8x128xf32>,
    } else {
    }
    %c0 = arith.constant 0 : index
    %c0_1 = arith.constant 0 : index
    %c0_2 = arith.constant 0 : index
    %7 = vector.load %arg4[%c0, %c0_1, %c0_2] : memref<1x8x128xf32, #tpu.memory_space<vmem>>, vector<1x8x128xf32>
    %8 = vector.shape_cast %7 : vector<1x8x128xf32> to vector<8x128xf32>
    %c0_3 = arith.constant 0 : index
    %c0_4 = arith.constant 0 : index
    %c0_5 = arith.constant 0 : index
    %9 = vector.load %arg5[%c0_3, %c0_4, %c0_5] : memref<1x8x128xf32, #tpu.memory_space<vmem>>, vector<1x8x128xf32>
    %10 = vector.shape_cast %9 : vector<1x8x128xf32> to vector<8x128xf32>
    %cst = arith.constant dense<0.000000e+00> : vector<8x8xf32>
    %11 = tpu.matmul %8, %10, %cst {dimension_numbers = #tpu.dot_dimension_numbers<[1], [1], [0], [0], [0, 0, 1, 0], [], []>} : vector<8x128xf32>, vector<8x128xf32>, vector<8x8xf32> -> vector<8x8xf32>
    %c0_6 = arith.constant 0 : index
    %c0_7 = arith.constant 0 : index
    %c0_8 = arith.constant 0 : index
    %12 = vector.load %arg6[%c0_6, %c0_7, %c0_8] : memref<1x8x128xf32, #tpu.memory_space<vmem>>, vector<1x8x128xf32>
    %13 = vector.shape_cast %12 : vector<1x8x128xf32> to vector<8x128xf32>
    %14 = arith.cmpi slt, %3, %1 : i32
    %15 = arith.extui %14 : i1 to i32
    %c0_i32_9 = arith.constant 0 : i32
    %16 = arith.cmpi ne, %15, %c0_i32_9 : i32
    scf.if %16 {
      %c0_11 = arith.constant 0 : index
      %c0_12 = arith.constant 0 : index
      %20 = vector.load %arg8[%c0_11, %c0_12] : memref<8x1xf32, #tpu.memory_space<vmem>>, vector<8x1xf32>
      %cst_13 = arith.constant dense<0xFF800000> : vector<8xf32>
      %21 = vector.multi_reduction <maximumf>, %11, %cst_13 [1] : vector<8x8xf32> to vector<8xf32>
      %22 = vector.shape_cast %21 : vector<8xf32> to vector<8x1xf32>
      %23 = arith.maximumf %20, %22 : vector<8x1xf32>
      %24 = arith.subf %20, %23 : vector<8x1xf32>
      %25 = math.exp %24 : vector<8x1xf32>
      %26 = vector.broadcast %23 : vector<8x1xf32> to vector<8x8xf32>
      %27 = arith.subf %11, %26 : vector<8x8xf32>
      %28 = math.exp %27 : vector<8x8xf32>
      %c0_14 = arith.constant 0 : index
      %c0_15 = arith.constant 0 : index
      %29 = vector.load %arg9[%c0_14, %c0_15] : memref<8x1xf32, #tpu.memory_space<vmem>>, vector<8x1xf32>
      %30 = arith.mulf %25, %29 : vector<8x1xf32>
      %cst_16 = arith.constant dense<0.000000e+00> : vector<8xf32>
      %31 = vector.multi_reduction <add>, %28, %cst_16 [1] : vector<8x8xf32> to vector<8xf32>
      %32 = vector.shape_cast %31 : vector<8xf32> to vector<8x1xf32>
      %33 = arith.addf %30, %32 : vector<8x1xf32>
      %c0_17 = arith.constant 0 : index
      %c0_18 = arith.constant 0 : index
      %34 = vector.load %arg9[%c0_17, %c0_18] : memref<8x1xf32, #tpu.memory_space<vmem>>, vector<8x1xf32>
      tpu.vector_store %arg9[%c0_17, %c0_18], %33 {strides = array<i32>} : memref<8x1xf32, #tpu.memory_space<vmem>>, vector<8x1xf32>,
      %c0_19 = arith.constant 0 : index
      %c0_20 = arith.constant 0 : index
      %35 = vector.load %arg10[%c0_19, %c0_20] : memref<8x128xf32, #tpu.memory_space<vmem>>, vector<8x128xf32>
      %36 = vector.broadcast %25 : vector<8x1xf32> to vector<8x128xf32>
      %37 = arith.mulf %36, %35 : vector<8x128xf32>
      %cst_21 = arith.constant dense<0.000000e+00> : vector<8x128xf32>
      %38 = tpu.matmul %28, %13, %cst_21 {dimension_numbers = #tpu.dot_dimension_numbers<[1], [0], [0], [1], [0, 0, 1, 1], [], []>} : vector<8x8xf32>, vector<8x128xf32>, vector<8x128xf32> -> vector<8x128xf32>
      %39 = arith.addf %37, %38 : vector<8x128xf32>
      %c0_22 = arith.constant 0 : index
      %c0_23 = arith.constant 0 : index
      %40 = vector.load %arg10[%c0_22, %c0_23] : memref<8x128xf32, #tpu.memory_space<vmem>>, vector<8x128xf32>
      tpu.vector_store %arg10[%c0_22, %c0_23], %39 {strides = array<i32>} : memref<8x128xf32, #tpu.memory_space<vmem>>, vector<8x128xf32>,
      %c0_24 = arith.constant 0 : index
      %c0_25 = arith.constant 0 : index
      %41 = vector.load %arg8[%c0_24, %c0_25] : memref<8x1xf32, #tpu.memory_space<vmem>>, vector<8x1xf32>
      tpu.vector_store %arg8[%c0_24, %c0_25], %23 {strides = array<i32>} : memref<8x1xf32, #tpu.memory_space<vmem>>, vector<8x1xf32>,
    } else {
    }
    %17 = arith.cmpi eq, %3, %1 : i32
    %18 = arith.extui %17 : i1 to i32
    %c0_i32_10 = arith.constant 0 : i32
    %19 = arith.cmpi ne, %18, %c0_i32_10 : i32
    scf.if %19 {
      %20 = tpu.iota {dimensions = array<i32: 1>} : vector<8x8xi32>
      %21 = tpu.iota {dimensions = array<i32: 0>} : vector<8x8xi32>
      %22 = arith.cmpi sgt, %20, %21 : vector<8x8xi32>
      %cst_11 = arith.constant 0xFF800000 : f32
      %23 = vector.broadcast %cst_11 : f32 to vector<8x8xf32>
      %24 = arith.select %22, %23, %11 : vector<8x8xi1>, vector<8x8xf32>
      %c0_12 = arith.constant 0 : index
      %c0_13 = arith.constant 0 : index
      %25 = vector.load %arg8[%c0_12, %c0_13] : memref<8x1xf32, #tpu.memory_space<vmem>>, vector<8x1xf32>
      %cst_14 = arith.constant dense<0xFF800000> : vector<8xf32>
      %26 = vector.multi_reduction <maximumf>, %24, %cst_14 [1] : vector<8x8xf32> to vector<8xf32>
      %27 = vector.shape_cast %26 : vector<8xf32> to vector<8x1xf32>
      %28 = arith.maximumf %25, %27 : vector<8x1xf32>
      %29 = arith.subf %25, %28 : vector<8x1xf32>
      %30 = math.exp %29 : vector<8x1xf32>
      %31 = vector.broadcast %28 : vector<8x1xf32> to vector<8x8xf32>
      %32 = arith.subf %24, %31 : vector<8x8xf32>
      %33 = math.exp %32 : vector<8x8xf32>
      %c0_15 = arith.constant 0 : index
      %c0_16 = arith.constant 0 : index
      %34 = vector.load %arg9[%c0_15, %c0_16] : memref<8x1xf32, #tpu.memory_space<vmem>>, vector<8x1xf32>
      %35 = arith.mulf %30, %34 : vector<8x1xf32>
      %cst_17 = arith.constant dense<0.000000e+00> : vector<8xf32>
      %36 = vector.multi_reduction <add>, %33, %cst_17 [1] : vector<8x8xf32> to vector<8xf32>
      %37 = vector.shape_cast %36 : vector<8xf32> to vector<8x1xf32>
      %38 = arith.addf %35, %37 : vector<8x1xf32>
      %c0_18 = arith.constant 0 : index
      %c0_19 = arith.constant 0 : index
      %39 = vector.load %arg9[%c0_18, %c0_19] : memref<8x1xf32, #tpu.memory_space<vmem>>, vector<8x1xf32>
      tpu.vector_store %arg9[%c0_18, %c0_19], %38 {strides = array<i32>} : memref<8x1xf32, #tpu.memory_space<vmem>>, vector<8x1xf32>,
      %c0_20 = arith.constant 0 : index
      %c0_21 = arith.constant 0 : index
      %40 = vector.load %arg10[%c0_20, %c0_21] : memref<8x128xf32, #tpu.memory_space<vmem>>, vector<8x128xf32>
      %41 = vector.broadcast %30 : vector<8x1xf32> to vector<8x128xf32>
      %42 = arith.mulf %41, %40 : vector<8x128xf32>
      %cst_22 = arith.constant dense<0.000000e+00> : vector<8x128xf32>
      %43 = tpu.matmul %33, %13, %cst_22 {dimension_numbers = #tpu.dot_dimension_numbers<[1], [0], [0], [1], [0, 0, 1, 1], [], []>} : vector<8x8xf32>, vector<8x128xf32>, vector<8x128xf32> -> vector<8x128xf32>
      %44 = arith.addf %42, %43 : vector<8x128xf32>
      %c0_23 = arith.constant 0 : index
      %c0_24 = arith.constant 0 : index
      %45 = vector.load %arg10[%c0_23, %c0_24] : memref<8x128xf32, #tpu.memory_space<vmem>>, vector<8x128xf32>
      tpu.vector_store %arg10[%c0_23, %c0_24], %44 {strides = array<i32>} : memref<8x128xf32, #tpu.memory_space<vmem>>, vector<8x128xf32>,
      %c0_25 = arith.constant 0 : index
      %c0_26 = arith.constant 0 : index
      %46 = vector.load %arg8[%c0_25, %c0_26] : memref<8x1xf32, #tpu.memory_space<vmem>>, vector<8x1xf32>
      tpu.vector_store %arg8[%c0_25, %c0_26], %28 {strides = array<i32>} : memref<8x1xf32, #tpu.memory_space<vmem>>, vector<8x1xf32>,
      %c0_27 = arith.constant 0 : index
      %c0_28 = arith.constant 0 : index
      %47 = vector.load %arg9[%c0_27, %c0_28] : memref<8x1xf32, #tpu.memory_space<vmem>>, vector<8x1xf32>
      %48 = tpu.reciprocal %47 {approx = true} : vector<8x1xf32> -> vector<8x1xf32>
      %49 = arith.mulf %47, %48 : vector<8x1xf32>
      %cst_29 = arith.constant 2.000000e+00 : f32
      %50 = vector.broadcast %cst_29 : f32 to vector<8x1xf32>
      %51 = arith.subf %50, %49 : vector<8x1xf32>
      %52 = arith.mulf %48, %51 : vector<8x1xf32>
      %c0_30 = arith.constant 0 : index
      %c0_31 = arith.constant 0 : index
      %53 = vector.load %arg10[%c0_30, %c0_31] : memref<8x128xf32, #tpu.memory_space<vmem>>, vector<8x128xf32>
      %54 = vector.broadcast %52 : vector<8x1xf32> to vector<8x128xf32>
      %55 = arith.mulf %53, %54 : vector<8x128xf32>
      %c0_32 = arith.constant 0 : index
      %c0_33 = arith.constant 0 : index
      %c0_34 = arith.constant 0 : index
      %56 = vector.load %arg7[%c0_32, %c0_33, %c0_34] : memref<1x8x128xf32, #tpu.memory_space<vmem>>, vector<1x8x128xf32>
      %57 = vector.shape_cast %56 : vector<1x8x128xf32> to vector<8x128xf32>
      %58 = vector.shape_cast %55 : vector<8x128xf32> to vector<1x8x128xf32>
      tpu.vector_store %arg7[%c0_32, %c0_33, %c0_34], %58 {strides = array<i32>} : memref<1x8x128xf32, #tpu.memory_space<vmem>>, vector<1x8x128xf32>,
    } else {
    }
    return
  }
  func.func @transform_0(%arg0: i32, %arg1: i32, %arg2: memref<1xi32, #tpu.memory_space<smem>>, %arg3: memref<1xi32, #tpu.memory_space<smem>>) -> (i32, i32, i32) {
    %0 = arith.index_cast %arg1 : i32 to index
    %1 = memref.load %arg2[%0] : memref<1xi32, #tpu.memory_space<smem>>
    %c0_i32 = arith.constant 0 : i32
    %c0_i32_0 = arith.constant 0 : i32
    return %arg0, %1, %c0_i32 : i32, i32, i32
  }
  func.func @transform_1(%arg0: i32, %arg1: i32, %arg2: memref<1xi32, #tpu.memory_space<smem>>, %arg3: memref<1xi32, #tpu.memory_space<smem>>) -> (i32, i32, i32) {
    %0 = arith.index_cast %arg1 : i32 to index
    %1 = memref.load %arg3[%0] : memref<1xi32, #tpu.memory_space<smem>>
    %c0_i32 = arith.constant 0 : i32
    %c0_i32_0 = arith.constant 0 : i32
    return %arg0, %1, %c0_i32 : i32, i32, i32
  }
  func.func @transform_2(%arg0: i32, %arg1: i32, %arg2: memref<1xi32, #tpu.memory_space<smem>>, %arg3: memref<1xi32, #tpu.memory_space<smem>>) -> (i32, i32, i32) {
    %0 = arith.index_cast %arg1 : i32 to index
    %1 = memref.load %arg3[%0] : memref<1xi32, #tpu.memory_space<smem>>
    %c0_i32 = arith.constant 0 : i32
    %c0_i32_0 = arith.constant 0 : i32
    return %arg0, %1, %c0_i32 : i32, i32, i32
  }
  func.func @transform_3(%arg0: i32, %arg1: i32, %arg2: memref<1xi32, #tpu.memory_space<smem>>, %arg3: memref<1xi32, #tpu.memory_space<smem>>) -> (i32, i32, i32) {
    %0 = arith.index_cast %arg1 : i32 to index
    %1 = memref.load %arg2[%0] : memref<1xi32, #tpu.memory_space<smem>>
    %c0_i32 = arith.constant 0 : i32
    %c0_i32_0 = arith.constant 0 : i32
    return %arg0, %1, %c0_i32 : i32, i32, i32
  }
}

</mosaic_0001>

<bundles_post_ra>
// kernel: tpu_custom_call.1
= control target key start
LH: loop header
LB: loop body
LE: loop exit
PB: predicated region body
PF: predicated region fallthrough
CT: control target
= control target key end

     0   :  { %s1722_s0 = inlined_call_operand.<no memory space> [shape: s32[1], index: 0, kind: input, shape index: {}]   ;;  %s1723_s1 = inlined_call_operand.<no memory space> [shape: s32[1], index: 1, kind: input, shape index: {}]   ;;  %s1724_s2 = inlined_call_operand.hbm [shape: f32[2,8,128], index: 2, kind: input, shape index: {}]   ;;  %s1725_s3 = inlined_call_operand.hbm [shape: f32[2,8,128], index: 3, kind: input, shape index: {}]   ;;  %s1726_s4 = inlined_call_operand.hbm [shape: f32[2,8,128], index: 4, kind: input, shape index: {}]   ;;  %s1727_s5 = inlined_call_operand.hbm [shape: f32[2,8,128], index: 5, kind: output, shape index: {}]  }
   0x1   :  { %1745 = sst [smem:[#allocation27_spill]] %s1725_s3 }
   0x2   :  { %1746 = sst [smem:[#allocation28_spill]] %s1727_s5 }
   0x3   :  { %10 = sst [smem:[#allocation6]] %s1722_s0 }
   0x4   :  { %11 = sst [smem:[#allocation7]] %s1723_s1 }
   0x5   :  { %12 = vsyncpa [#allocation9], 0 }
   0x6   :  { %14 = vsyncpa [#allocation9 + $0x1], 0 }
   0x7   :  { %15 = vsyncpa [#allocation12], 0 }
   0x8   :  { %17 = vsyncpa [#allocation12 + $0x1], 0 }
   0x9   :  { %18 = vsyncpa [#allocation10], 0 }
   0xa   :  { %20 = vsyncpa [#allocation10 + $0x1], 0  ;;  %s1283_s22 = smov 0   ;;  %s1285_s23 = smov 0  }
   0xb   :  { %s1287_s24 = smov 0   ;;  %s1289_s25 = smov 0  }
   0xc   :  { %s1291_s26 = smov 0   ;;  %s1293_s0 = smov 0  }
   0xd   :  { %s1295_s27 = smov 0   ;;  %s1297_s1 = smov 0  }
   0xe   :  { %s1299_s28 = smov 0   ;;  %s1301_s29 = smov 0  }
   0xf   :  { %s1303_s30 = smov 0   ;;  %s1305_s6 = smov 0  }
  0x10   :  { %s1307_s7 = smov 0   ;;  %s1309_s8 = smov 0  }
  0x11   :  { %s1311_s9 = smov 0  }
  0x12 LB: > { %1747 = sst [smem:[#allocation19_spill]] %s1175_s22  ;;  %s1357_s10 = sadd.s32 4294967295, %s1231_s9   ;;  %s1231_s9 = sphi %s1311_s9, %s26_s9   ;;  %s1227_s8 = sphi %s1309_s8, %s1808_s8   ;;  %s1223_s7 = sphi %s1307_s7, %s1807_s7   ;;  %s1219_s6 = sphi %s1305_s6, %s1806_s6   ;;  %s1215_s30 = sphi %s1303_s30, %s1805_s30   ;;  %s1211_s29 = sphi %s1301_s29, %s1804_s29   ;;  %s1207_s28 = sphi %s1299_s28, %s1803_s28   ;;  %s1203_s1 = sphi %s1297_s1, %s1802_s1   ;;  %s1199_s27 = sphi %s1295_s27, %s1801_s27   ;;  %s1195_s0 = sphi %s1293_s0, %s1800_s0   ;;  %s1191_s26 = sphi %s1291_s26, %s1799_s26   ;;  %s1187_s25 = sphi %s1289_s25, %s1798_s25   ;;  %s1183_s24 = sphi %s1287_s24, %s1797_s24   ;;  %s1179_s23 = sphi %s1285_s23, %s1796_s23   ;;  %s1175_s22 = sphi %s1283_s22, %s1795_s22  }
  0x13   : > { %1748 = sst [smem:[#allocation20_spill]] %s1179_s23  ;;  %s767_s11 = sadd.s32 4294967294, %s1231_s9  }
  0x14   : > { %1749 = sst [smem:[#allocation21_spill]] %s1223_s7  ;;  %s38_s12 = sadd.s32 1, %s1227_s8 }
  0x15   : > { %p1740_p0 = scmp.eq.s32.totalorder %s1231_s9, 0  ;;  %p40_p1 = scmp.ge.s32.totalorder %s38_s12, 2 }
  0x16   : > { %p1738_p2 = scmp.eq.s32.totalorder %s1357_s10, 0  ;;  %s72_s13 = sld [smem:[#allocation7]] }
  0x17   : > { %s79_s14 = sadd.s32 1, %s1207_s28  ;;  %s1810_s12 = smov (%p40_p1, %s38_s12), 0 }
  0x18   : > { %1750 = sst [smem:[#allocation22_spill]] %s1810_s12  ;;  %p86_p3 = scmp.ne.s32.totalorder %s1207_s28, %s1203_s1 }
  0x19   : > { %p92_p4 = scmp.ne.s32.totalorder %s1203_s1, %s1199_s27  ;;  %s44_s15 = ssub.s32 %s1227_s8, %s1810_s12 }
  0x1a   : > { %s1371_s16 = sld [smem:[#allocation6]]  ;;  %p1375_p5 = por %p86_p3, %p1740_p0 }
  0x1b   : > { %p1381_p6 = por %p92_p4, %p1738_p2  ;;  %s139_s19 = sadd.s32 1, %s1183_s24 }
  0x1c   : > { %p149_p7 = scmp.ne.s32.totalorder %s1183_s24, %s1179_s23  ;;  %p150_p8 = scmp.eq.s32.totalorder %s1357_s10, 1 }
  0x1d   : > { %s1752_s18 = scalar_select %p1381_p6, 1, 0 }
  0x1e   : > { %p155_p9 = scmp.ne.s32.totalorder %s1179_s23, %s1175_s22  ;;  %p1391_p10 = scmp.eq.s32.totalorder %s44_s15, 0 }
  0x1f   : > { %1753 = sst [smem:[#allocation23_spill]] %s1752_s18  ;;  %p1395_p11 = por %p150_p8, %p149_p7 }
  0x20   : > { %p156_p12 = scmp.eq.s32.totalorder %s767_s11, 1  ;;  %p1739_p3 = scmp.lt.s32.totalorder %s1231_s9, 2 }
  0x21   : > { %s1755_s21 = scalar_select %p1395_p11, 1, 0 }
  0x22   : > { %s1402_s27 = scalar_select %p1391_p10, %s1207_s28, %s79_s14  }
  0x23   : > { %1756 = sst [smem:[#allocation24_spill]] %s1755_s21  ;;  %p1404_p13 = por %p156_p12, %p155_p9 }
  0x24   : > { %1757 = sst [smem:[#allocation25_spill]] %s1402_s27  ;;  %s196_s15 = sand.u32 1, %s1231_s9  }
  0x25   : > { %s1758_s12 = scalar_select %p1404_p13, 1, 0 }
  0x26   : > { %s1414_s22 = scalar_select %p1391_p10, %s1183_s24, %s139_s19  }
  0x27   : > { %1759 = sst [smem:[#allocation26_spill]] %s1758_s12  ;;  %s198_s5 = sand.u32 1, %s1207_s28  }
  0x28   : > { %s772_s21 = sshll.u32 %s198_s5, 3  ;;  %s205_s7 = sadd.s32 %s1227_s8, %s72_s13 }
  0x29   : > { %s1418_s23 = sshll.u32 %s205_s7, 7  ;;  %s1760_s3 = sld [smem:[#allocation27_spill]] }
  0x2a   : > { %s200_s12 = scalar_lea.vmem [#allocation11], %s772_s21  ;;  %p1432_p4 = pnand %p1739_p3, %p1375_p5 }
  0x2b   : > { %s209_s18 = sshll.u32 %s200_s12, 4  ;;  %s1438_s7 = scalar_lea.sflag [#allocation12], %s196_s15  ;;  %s1426_s18 = int_to_ptr.vmem [resolvable:$true] %s209_s18 }
  0x2c   : > { %p981_p12 = pneg %p1432_p4 }
  0x2f   : > { %s1424_s27 = scalar_lea.hbm %s1760_s3, %s1418_s23  ;;  %s984_s19 = scalar_lea.hbm %s1760_s3, 256 }
  0x30   : > { %s979_s13 = scalar_lea.hbm %s1424_s27, 128  ;;  %p985_p5 = scmp.lt.u32.totalorder %s1424_s27, %s1760_s3 }
  0x31   : > { %p980_p9 = scmp.ne.s32.totalorder %s1424_s27, %s979_s13  ;;  %p986_p3 = scmp.lt.u32.totalorder %s984_s19, %s979_s13 }
  0x32   : > { %p988_p7 = scmp.lt.u32.totalorder %s979_s13, %s1424_s27 }
  0x33   : > { %p982_p1 = pnand %p981_p12, %p980_p9  ;;  %p987_p0 = por %p986_p3, %p985_p5 }
  0x35   : > { %p983_p2 = pneg %p982_p1  ;;  %p989_p8 = por %p988_p7, %p987_p0 }
  0x37   : > { %p990_p13 = pnand %p989_p8, %p983_p2 }
  0x39   : > { %993 = shalt.err (!%p990_p13)
}
  0x3a   : > { %s994_s15 = scalar_lea.vmem %s1426_s18, 128  ;;  %s1233_s14 = smov [#allocation11]  }
  0x3b   : > { %p995_p1 = scmp.ne.s32.totalorder %s1426_s18, %s994_s15  ;;  %s999_s12 = sshll.u32 %s1233_s14, 4  ;;  %s1000_s12 = int_to_ptr.vmem [resolvable:$false] %s999_s12 }
  0x3c   : > { %s1001_s17 = scalar_lea.vmem %s1000_s12, 256  ;;  %p1002_p6 = scmp.lt.s32.totalorder %s1426_s18, %s1000_s12 }
  0x3d   : > { %p997_p9 = pnand %p995_p1, %p981_p12  ;;  %p1003_p3 = scmp.lt.s32.totalorder %s1001_s17, %s994_s15 }
  0x3f   : > { %p998_p11 = pneg %p997_p9  ;;  %p1004_p5 = por %p1003_p3, %p1002_p6 }
  0x41   : > { %p1005_p0 = pnand %p1004_p5, %p998_p11 }
  0x43   : > { %1008 = shalt.err (!%p1005_p0)
}
  0x44   : > { %825 = dma.hbm_to_vmem [thread:$0]  (!%p1432_p4), %s1424_s27, 128, %s1426_s18, %s1438_s7  }
  0x45   : > { %p1762_p2 = scmp.lt.s32.totalorder %s1231_s9, 3  ;;  %p1763_p6 = scmp.ge.s32.totalorder %s1231_s9, 1 }
  0x46   : > { %s49_s13 = sadd.s32 1, %s1219_s6  ;;  %p56_p13 = scmp.ne.s32.totalorder %s1219_s6, %s1215_s30 }
  0x47   : > { %p1470_p11 = pnand %p1763_p6, %p1762_p2  ;;  %p1765_p7 = scmp.eq.s32.totalorder %s1231_s9, 0 }
  0x48   : > { %s1480_s19 = scalar_select %p1391_p10, %s1219_s6, %s49_s13  }
  0x49   : > { %s1764_s5 = scalar_select %p1470_p11, 1, 0 }
  0x4a   : > { %p58_p8 = por %p1765_p7, %p56_p13  ;;  %p62_p12 = scmp.ne.s32.totalorder %s1215_s30, %s1211_s29 }
  0x4b   : > { %s176_s21 = sand.u32 1, %s1219_s6   ;;  %s185_s11 = sadd.s32 %s1227_s8, %s1371_s16 }
  0x4c   : > { %p1766_p1 = scmp.eq.s32.totalorder %s1357_s10, 0  ;;  %s770_s18 = sshll.u32 %s176_s21, 3 }
  0x4d   : > { %s771_s27 = sshll.u32 %s185_s11, 7  ;;  %s180_s13 = scalar_lea.vmem [#allocation8], %s770_s18 }
  0x4e   : > { %p1491_p9 = por %p1766_p1, %p62_p12  ;;  %s1498_s17 = scalar_lea.hbm %s1724_s2, %s771_s27 }
  0x4f   : > { %s189_s29 = sshll.u32 %s180_s13, 4  ;;  %p1768_p4 = scmp.lt.s32.totalorder %s1231_s9, 2  ;;  %s1506_s29 = int_to_ptr.vmem [resolvable:$true] %s189_s29 }
  0x50   : > { %s1767_s15 = scalar_select %p1491_p9, 1, 0 }
  0x51   : > { %p1502_p3 = pnand %p1768_p4, %p58_p8  ;;  %s177_s11 = scalar_lea.sflag [#allocation9], %s176_s21 }
  0x52   : > { %s1009_s3 = scalar_lea.hbm %s1498_s17, 128  ;;  %s1014_s14 = scalar_lea.hbm %s1724_s2, 256 }
  0x53   : > { %p1010_p5 = scmp.ne.s32.totalorder %s1498_s17, %s1009_s3  ;;  %p1011_p0 = pneg %p1502_p3 }
  0x54   : > { %p1015_p13 = scmp.lt.u32.totalorder %s1498_s17, %s1724_s2  ;;  %p1016_p7 = scmp.lt.u32.totalorder %s1014_s14, %s1009_s3 }
  0x55   : > { %p1012_p2 = pnand %p1011_p0, %p1010_p5  ;;  %p1018_p12 = scmp.lt.u32.totalorder %s1009_s3, %s1498_s17 }
  0x56   : > { %p1017_p8 = por %p1016_p7, %p1015_p13 }
  0x57   : > { %p1013_p6 = pneg %p1012_p2 }
  0x58   : > { %p1019_p1 = por %p1018_p12, %p1017_p8 }
  0x5a   : > { %p1020_p4 = pnand %p1019_p1, %p1013_p6 }
  0x5c   : > { %1023 = shalt.err (!%p1020_p4)
}
  0x5d   : > { %s1024_s21 = scalar_lea.vmem %s1506_s29, 128  ;;  %s1234_s18 = smov [#allocation8]  }
  0x5e   : > { %p1025_p5 = scmp.ne.s32.totalorder %s1506_s29, %s1024_s21  ;;  %s1029_s27 = sshll.u32 %s1234_s18, 4  ;;  %s1030_s27 = int_to_ptr.vmem [resolvable:$false] %s1029_s27 }
  0x5f   : > { %s1031_s12 = scalar_lea.vmem %s1030_s27, 256  ;;  %p1032_p11 = scmp.lt.s32.totalorder %s1506_s29, %s1030_s27 }
  0x60   : > { %p1027_p2 = pnand %p1025_p5, %p1011_p0  ;;  %p1033_p13 = scmp.lt.s32.totalorder %s1031_s12, %s1024_s21 }
  0x62   : > { %p1028_p9 = pneg %p1027_p2  ;;  %p1034_p7 = por %p1033_p13, %p1032_p11 }
  0x64   : > { %p1035_p8 = pnand %p1034_p7, %p1028_p9 }
  0x66   : > { %1038 = shalt.err (!%p1035_p8)
}
  0x67   : > { %822 = dma.hbm_to_vmem [thread:$0]  (!%p1502_p3), %s1498_s17, 128, %s1506_s29, %s177_s11  }
  0x68   : > { %s109_s3 = sadd.s32 1, %s1195_s0  ;;  %p116_p11 = scmp.ne.s32.totalorder %s1195_s0, %s1191_s26 }
  0x69   : > { %s1539_s14 = scalar_select %p1391_p10, %s1195_s0, %s109_s3  }
  0x6a   : > { %p1770_p9 = scmp.eq.s32.totalorder %s1231_s9, 0  ;;  %p122_p6 = scmp.ne.s32.totalorder %s1191_s26, %s1187_s25 }
  0x6b   : > { %s218_s16 = sand.u32 1, %s1195_s0   ;;  %s1550_s18 = scalar_lea.hbm %s1726_s4, %s1418_s23 }
  0x6c   : > { %p118_p0 = por %p116_p11, %p1770_p9  ;;  %p1771_p12 = scmp.eq.s32.totalorder %s1357_s10, 0 }
  0x6d   : > { %s774_s20 = sshll.u32 %s218_s16, 3  ;;  %p1773_p10 = scmp.lt.s32.totalorder %s1231_s9, 2 }
  0x6e   : > { %p1554_p3 = por %p122_p6, %p1771_p12  ;;  %s220_s25 = scalar_lea.vmem [#allocation13], %s774_s20 }
  0x6f   : > { %p1560_p1 = pnand %p1773_p10, %p118_p0  ;;  %s229_s23 = sshll.u32 %s220_s25, 4  ;;  %s230_s23 = int_to_ptr.vmem [resolvable:$true] %s229_s23 }
  0x70   : > { %s1772_s17 = scalar_select %p1554_p3, 1, 0 }
  0x71   : > { %s1039_s11 = scalar_lea.hbm %s1550_s18, 128  ;;  %p1041_p5 = pneg %p1560_p1 }
  0x72   : > { %p1040_p4 = scmp.ne.s32.totalorder %s1550_s18, %s1039_s11  ;;  %s1044_s3 = scalar_lea.hbm %s1726_s4, 256 }
  0x73   : > { %p1045_p7 = scmp.lt.u32.totalorder %s1550_s18, %s1726_s4  ;;  %p1046_p8 = scmp.lt.u32.totalorder %s1044_s3, %s1039_s11 }
  0x74   : > { %p1042_p2 = pnand %p1041_p5, %p1040_p4  ;;  %p1048_p9 = scmp.lt.u32.totalorder %s1039_s11, %s1550_s18 }
  0x75   : > { %p1047_p11 = por %p1046_p8, %p1045_p7 }
  0x76   : > { %p1043_p13 = pneg %p1042_p2 }
  0x77   : > { %p1049_p0 = por %p1048_p9, %p1047_p11 }
  0x79   : > { %p1050_p6 = pnand %p1049_p0, %p1043_p13 }
  0x7b   : > { %1053 = shalt.err (!%p1050_p6)
}
  0x7c   : > { %s1054_s21 = scalar_lea.vmem %s230_s23, 128  ;;  %s1235_s20 = smov [#allocation13]  }
  0x7d   : > { %p1055_p12 = scmp.ne.s32.totalorder %s230_s23, %s1054_s21  ;;  %s1059_s25 = sshll.u32 %s1235_s20, 4  ;;  %s1060_s25 = int_to_ptr.vmem [resolvable:$false] %s1059_s25 }
  0x7e   : > { %s1061_s27 = scalar_lea.vmem %s1060_s25, 256  ;;  %p1062_p2 = scmp.lt.s32.totalorder %s230_s23, %s1060_s25 }
  0x7f   : > { %p1057_p10 = pnand %p1055_p12, %p1041_p5  ;;  %p1063_p3 = scmp.lt.s32.totalorder %s1061_s27, %s1054_s21 }
  0x81   : > { %p1058_p4 = pneg %p1057_p10  ;;  %p1064_p7 = por %p1063_p3, %p1062_p2 }
  0x83   : > { %p1065_p8 = pnand %p1064_p7, %p1058_p4 }
  0x85   : > { %1068 = shalt.err (!%p1065_p8)
}
  0x86   : > { %828 = dma.hbm_to_vmem [thread:$0]  (!%p1560_p1), %s1550_s18, 128, %s230_s23, %s1438_s7  }
  0x87   : > { %p1775_p13 = scmp.ne.s32.totalorder %s1764_s5, 0 }
  0x88   : > { %s240_s11 = sand.u32 (!%p1775_p13), 1, %s1215_s30   ;;  %p1776_p5 = scmp.ne.s32.totalorder (!%p1775_p13), %s1767_s15, 0 }
  0x89   : > { %238 = sbr.rel (%p1775_p13) target bundleno = 1518 (0x5ee), region = 32  ;;  %s1589_s12 = sshll.u32 (!%p1775_p13), %s240_s11, 3 }
  0x8a   : > { %s241_s3 = scalar_lea.sflag (!%p1775_p13), [#allocation9], %s240_s11  ;;  %s244_s16 = scalar_lea.vmem (!%p1775_p13), [#allocation8], %s1589_s12 }
  0x90   : > { %1158 = dma.done.wait (%p1776_p5), %s241_s3, 128  }
  0x91   : > { %1160 = vsyncadd (%p1776_p5), %s241_s3, 4294967168  ;;  %s1777_s29 = sld [smem:[#allocation23_spill]]  ;;  %s249_s7 = sand.u32 1, %s1357_s10  }
  0x92   : > { %s251_s18 = sand.u32 1, %s1203_s1   ;;  %s250_s23 = scalar_lea.sflag [#allocation12], %s249_s7 }
  0x93   : > { %s778_s5 = sshll.u32 %s251_s18, 3 }
  0x94   : > { %s253_s13 = scalar_lea.vmem [#allocation11], %s778_s5 }
  0x97   : > { %p1778_p3 = scmp.ne.s32.totalorder %s1777_s29, 0 }
  0x99   : > { %1162 = dma.done.wait (%p1778_p3), %s250_s23, 128  }
  0x9a   : > { %1164 = vsyncadd (%p1778_p3), %s250_s23, 4294967168  ;;  %s260_s21 = sand.u32 1, %s1191_s26   ;;  %p1779_p1 = scmp.ne.s32.totalorder %s1772_s17, 0 }
  0x9b   : > { %s779_s20 = sshll.u32 %s260_s21, 3 }
  0x9c   : > { %s262_s25 = scalar_lea.vmem [#allocation13], %s779_s20 }
  0x9d   : > { %1166 = dma.done.wait (%p1779_p1), %s250_s23, 128  }
  0x9e   : > { %1168 = vsyncadd (%p1779_p1), %s250_s23, 4294967168  ;;  %s1780_s10 = sld [smem:[#allocation20_spill]]  ;;  %s1608_s27 = sld [smem:[#allocation6]] }
  0x9f   : > { %s1610_s11 = sld [smem:[#allocation7]] }
  0xa4   : > { %s292_s15 = sand.u32 1, %s1780_s10  }
  0xa5   : > { %s1614_s3 = sshll.u32 %s292_s15, 3  ;;  %p781_p11 = scmp.ne.s32.totalorder %s1610_s11, 0 }
  0xa6   : > { %s294_s29 = scalar_lea.vmem [#allocation14], %s1614_s3  ;;  %vm305_vm0 = vcmask (!%p781_p11), 7168   ;;  %v1236_v0 = vmov (!%p781_p11), -inf   ;;  %v1237_v1 = vmov (!%p781_p11), 0.0  }
  0xa7   : > { %304 = sbr.rel (%p781_p11) target bundleno = 174 (0xae), region = 48  ;;  %306 = vst.msk [vmem:[#allocation2] sm:$0xff] (!%p781_p11), %vm305_vm0, %v1236_v0  ;;  %307 = vst.msk [vmem:[#allocation3] sm:$0xff] (!%p781_p11), %vm305_vm0, %v1237_v1 }
  0xa8   : > { %308 = vst [vmem:[#allocation4] sm:$0xff] (!%p781_p11), %v1237_v1 }
  0xae PF: > { %v310_v2 = vld [vmem:[%s253_s13] sm:$0xff]  ;;  %v1238_v3 = vmov 0.0   ;;  %vm1239_vm1 = vmmov 0   ;;  %v309_v4 = vld [vmem:[%s244_s16] sm:$0xff]  ;;  %p782_p9 = scmp.ge.s32.totalorder %s1610_s11, %s1608_s27 }
  0xaf   : > { %796 = vmatprep.subr.mxu0 %v1238_v3  ;;  %798 = vmatprep.mubr.msk.f32.mxu0 %vm1239_vm1, %v1238_v3  ;;  %v1620_v5 = vld [vmem:[%s262_s25] sm:$0xff]  ;;  %vm387_vm2 = vcmask (!%p782_p9), 64512   ;;  %v1240_v9 = vmov (!%p782_p9), 0   ;;  %vm409_vm3 = vcmask (!%p782_p9), 7168   ;;  %v1241_v14 = vmov (!%p782_p9), 0.0   ;;  %v403_v22 = vld [vmem:[#allocation3] sm:$0xff] (!%p782_p9) }
  0xb0   : > { %797 = vmatpush3.xpose.msra.mxu0 %v310_v2  ;;  %965 = vset.pattern.permute.xlu0 (!%p782_p9), %v1240_v9  ;;  %v386_v10 = vld [vmem:[#allocation2] sm:$0xff] (!%p782_p9)  ;;  %vm1242_vm4 = vmmov (!%p782_p9), 0   ;;  %v411_v26 = vld [vmem:[#allocation4] sm:$0xff] (!%p782_p9) }
  0xb1   : > { %966 = vset.pattern.permute.xlu1 (!%p782_p9), %v1240_v9  ;;  %801 = vmatprep.subr.mxu0 (!%p782_p9), %v1241_v14 }
  0xb3   : > { %799 = vmatmul.mubr.f32.vlgmr.msra.gmra.mrb[0].mxu0 %v309_v4 }
  0xb4   : > { %803 = vmatprep.mubr.msk.f32.mxu0 (!%p782_p9), %vm1242_vm4, %v1241_v14  ;;  %802 = vmatpush3.msra.mxu0 (!%p782_p9), %v1620_v5 }
 0x181   : > { %385 = sbr.rel (%p782_p9) target bundleno = 894 (0x37e), region = 52 }
 0x186   : > { %v377_v6 = vpop.f32.mrb[0].mxu0 }
 0x187   : > { %v800_v7 = vpop.f32.mrb[1].mxu0  ;;  %v388_v8 = vsel (!%p782_p9), %vm387_vm2, %v377_v6, -inf }
 0x188   : > { %389 = vmax.xlane.f32.xlu0 %v388_v8 }
 0x215   : > { %v390_v11 = vpop.xlane.xlu0 %389 }
 0x216   : > { %v391_v12 = vmax.f32 %v386_v10, %v390_v11 }
 0x218   : > { %v392_v13 = vsub.f32 %v386_v10, %v391_v12  ;;  %493 = vst.msk [vmem:[#allocation2] sm:$0xff] %vm409_vm3, %v391_v12  ;;  %397 = vperm.xlu0 %965, %v391_v12  }
 0x21a   : > { %v393_v20 = vmul.f32 1.442695, %v392_v13 }
 0x297   : > { %v398_v15 = vpop.permute.xlu0 %397 }
 0x298   : > { %v400_v16 = vsub.f32 %v377_v6, %v398_v15 }
 0x29a   : > { %v401_v17 = vmul.f32 1.442695, %v400_v16 }
 0x29c   : > { %967 = vpow2.f32 %v401_v17 }
 0x29d   : > { %969 = vpow2.f32 %v393_v20 }
 0x2a6   : > { %v968_v18 = vpop.eup %967 }
 0x2a7   : > { %804 = vmatmul.mubr.msk.f32.vlgmr.msra.gmra.mrb[0].mxu0 %vm387_vm2, %v968_v18  ;;  %v405_v19 = vsel %vm387_vm2, %v968_v18, 0.0  ;;  %v970_v21 = vpop.eup %969 }
 0x2a8   : > { %406 = vadd.xlane.f32.xlu1 %v405_v19  ;;  %v404_v23 = vmul.f32 %v970_v21, %v403_v22 }
 0x2b9   : > { %414 = vperm.xlu1 %966, %v970_v21  }
 0x335   : > { %v407_v24 = vpop.xlane.xlu1 %406 }
 0x336   : > { %v408_v25 = vadd.f32 %v407_v24, %v404_v23 }
 0x338   : > { %410 = vst.msk [vmem:[#allocation3] sm:$0xff] %vm409_vm3, %v408_v25 }
 0x339   : > { %v415_v27 = vpop.permute.xlu1 %414 }
 0x33a   : > { %v417_v28 = vmul.f32 %v415_v27, %v411_v26 }
 0x37a   : > { %v487_v29 = vpop.f32.mrb[0].mxu0 }
 0x37b   : > { %v491_v30 = vadd.f32 %v487_v29, %v417_v28  ;;  %v805_v31 = vpop.f32.mrb[1].mxu0 }
 0x37d   : > { %492 = vst [vmem:[#allocation4] sm:$0xff] %v491_v30 }
 0x37e PF: > { %p784_p0 = scmp.ne.s32.totalorder %s1610_s11, %s1608_s27 }
 0x37f   : > { %v498_v32 = vlaneseq (!%p784_p0)  ;;  %vm505_vm5 = vcmask (!%p784_p0), 64512   ;;  %v1243_v37 = vmov (!%p784_p0), 0   ;;  %v504_v38 = vld [vmem:[#allocation2] sm:$0xff] (!%p784_p0)  ;;  %vm527_vm7 = vcmask (!%p784_p0), 7168   ;;  %v521_v50 = vld [vmem:[#allocation3] sm:$0xff] (!%p784_p0) }
 0x380   : > { %497 = sbr.rel (%p784_p0) target bundleno = 1490 (0x5d2), region = 56  ;;  %971 = vset.pattern.permute.xlu0 (!%p784_p0), %v1243_v37  ;;  %972 = vset.pattern.permute.xlu1 (!%p784_p0), %v1243_v37  ;;  %v1244_v42 = vmov (!%p784_p0), 0.0   ;;  %vm1245_vm8 = vmmov (!%p784_p0), 0  }
 0x381   : > { %v499_v33 = vand.u32 (!%p784_p0), 127, %v498_v32  ;;  %v501_v34 = vshrl.u32 (!%p784_p0), %v498_v32, 7  ;;  %806 = vmatprep.subr.mxu0 (!%p784_p0), %v1244_v42  ;;  %808 = vmatprep.mubr.msk.f32.mxu0 (!%p784_p0), %vm1245_vm8, %v1244_v42 }
 0x382   : > { %807 = vmatpush3.msra.mxu0 (!%p784_p0), %v1620_v5 }
 0x383   : > { %vm502_vm6 = vcmp.gt.s32.totalorder (!%p784_p0), %v499_v33, %v501_v34 }
 0x384   : > { %v503_v35 = vsel (!%p784_p0), %vm502_vm6, -inf, %v377_v6  ;;  %v529_v59 = vld [vmem:[#allocation4] sm:$0xff] (!%p784_p0) }
 0x385   : > { %v506_v36 = vsel (!%p784_p0), %vm505_vm5, %v503_v35, -inf }
 0x386   : > { %507 = vmax.xlane.f32.xlu0 (!%p784_p0), %v506_v36 }
 0x413   : > { %v508_v39 = vpop.xlane.xlu0 %507 }
 0x414   : > { %v509_v40 = vmax.f32 %v504_v38, %v508_v39 }
 0x416   : > { %v510_v41 = vsub.f32 %v504_v38, %v509_v40  ;;  %611 = vst.msk [vmem:[#allocation2] sm:$0xff] %vm527_vm7, %v509_v40  ;;  %515 = vperm.xlu0 %971, %v509_v40  }
 0x418   : > { %v511_v48 = vmul.f32 1.442695, %v510_v41 }
 0x495   : > { %v516_v43 = vpop.permute.xlu0 %515 }
 0x496   : > { %v518_v44 = vsub.f32 %v503_v35, %v516_v43 }
 0x498   : > { %v519_v45 = vmul.f32 1.442695, %v518_v44 }
 0x49a   : > { %973 = vpow2.f32 %v519_v45 }
 0x49b   : > { %975 = vpow2.f32 %v511_v48 }
 0x4a4   : > { %v974_v46 = vpop.eup %973 }
 0x4a5   : > { %809 = vmatmul.mubr.msk.f32.vlgmr.msra.gmra.mrb[0].mxu0 %vm505_vm5, %v974_v46  ;;  %v523_v47 = vsel %vm505_vm5, %v974_v46, 0.0  ;;  %v976_v49 = vpop.eup %975 }
 0x4a6   : > { %524 = vadd.xlane.f32.xlu1 %v523_v47  ;;  %v522_v51 = vmul.f32 %v976_v49, %v521_v50 }
 0x4b7   : > { %532 = vperm.xlu1 %972, %v976_v49  }
 0x533   : > { %v525_v52 = vpop.xlane.xlu1 %524 }
 0x534   : > { %v526_v53 = vadd.f32 %v525_v52, %v522_v51 }
 0x536   : > { %528 = vst.msk [vmem:[#allocation3] sm:$0xff] %vm527_vm7, %v526_v53 }
 0x537   : > { %v533_v60 = vpop.permute.xlu1 %532 }
 0x538   : > { %v535_v61 = vmul.f32 %v533_v60, %v529_v59 }
 0x53d   : > { %v612_v54 = vld [vmem:[#allocation3] sm:$0xff] }
 0x53e   : > { %977 = vrcp.f32 %v612_v54 }
 0x548   : > { %v978_v55 = vpop.eup %977 }
 0x549   : > { %v614_v56 = vmul.f32 %v978_v55, %v612_v54 }
 0x54b   : > { %v615_v57 = vsub.f32 2.0, %v614_v56 }
 0x54d   : > { %v616_v58 = vmul.f32 %v978_v55, %v615_v57 }
 0x54f   : > { %620 = vperm.xlu1 %972, %v616_v58  }
 0x578   : > { %v605_v62 = vpop.f32.mrb[0].mxu0 }
 0x579   : > { %v609_v63 = vadd.f32 %v605_v62, %v535_v61  ;;  %v810_v0 = vpop.f32.mrb[1].mxu0 }
 0x57b   : > { %610 = vst [vmem:[#allocation4] sm:$0xff] %v609_v63 }
 0x5ce   : > { %v621_v1 = vpop.permute.xlu1 %620 }
 0x5cf   : > { %v623_v2 = vmul.f32 %v621_v1, %v609_v63 }
 0x5d1   : > { %624 = vst [vmem:[%s294_s29] sm:$0xff] %v623_v2 }
 0x5d2 PF: > { %s633_s17 = sld [smem:[#allocation6]]  ;;  %s1781_s12 = sld [smem:[#allocation21_spill]] }
 0x5d3   : > { %s1783_s7 = sld [smem:[#allocation24_spill]]  ;;  %s641_s18 = sshll.u32 %s294_s29, 4  ;;  %s1643_s18 = int_to_ptr.vmem [resolvable:$true] %s641_s18 }
 0x5d4   : > { %s1784_s20 = sld [smem:[#allocation28_spill]]  ;;  %s626_s10 = scalar_lea.sflag [#allocation10], %s292_s15 }
 0x5d5   : > { %s1069_s27 = scalar_lea.vmem %s1643_s18, 128  ;;  %s1246_s11 = smov [#allocation14]  }
 0x5d6   : > { %p1070_p6 = scmp.ne.s32.totalorder %s1643_s18, %s1069_s27  ;;  %s1073_s3 = sshll.u32 %s1246_s11, 4  ;;  %s1074_s3 = int_to_ptr.vmem [resolvable:$false] %s1073_s3 }
 0x5d7   : > { %s1075_s29 = scalar_lea.vmem %s1074_s3, 256  ;;  %p1076_p2 = scmp.lt.s32.totalorder %s1643_s18, %s1074_s3 }
 0x5d8   : > { %s637_s5 = sadd.s32 %s1781_s12, %s633_s17  ;;  %p1077_p7 = scmp.lt.s32.totalorder %s1075_s29, %s1069_s27 }
 0x5d9   : > { %s787_s23 = sshll.u32 %s637_s5, 7  ;;  %p1785_p12 = scmp.ne.s32.totalorder %s1783_s7, 0 }
 0x5da   : > { %s639_s25 = scalar_lea.hbm %s1784_s20, %s787_s23  ;;  %p1078_p8 = por %p1077_p7, %p1076_p2 }
 0x5db   : > { %p1071_p10 = pnand %p1070_p6, %p1785_p12 }
 0x5dd   : > { %p1072_p4 = pneg %p1071_p10 }
 0x5df   : > { %p1079_p13 = pnand %p1078_p8, %p1072_p4 }
 0x5e1   : > { %1082 = shalt.err (!%p1079_p13)
}
 0x5e2   : > { %s1083_s17 = scalar_lea.hbm %s639_s25, 128  ;;  %s1087_s16 = scalar_lea.hbm %s1784_s20, 256 }
 0x5e3   : > { %p1084_p5 = scmp.ne.s32.totalorder %s639_s25, %s1083_s17  ;;  %p1088_p11 = scmp.lt.u32.totalorder %s639_s25, %s1784_s20 }
 0x5e4   : > { %p1089_p9 = scmp.lt.u32.totalorder %s1087_s16, %s1083_s17  ;;  %p1091_p6 = scmp.lt.u32.totalorder %s1083_s17, %s639_s25 }
 0x5e5   : > { %p1085_p3 = pnand %p1084_p5, %p1785_p12 }
 0x5e6   : > { %p1090_p0 = por %p1089_p9, %p1088_p11 }
 0x5e7   : > { %p1086_p1 = pneg %p1085_p3 }
 0x5e8   : > { %p1092_p10 = por %p1091_p6, %p1090_p0 }
 0x5ea   : > { %p1093_p4 = pnand %p1092_p10, %p1086_p1 }
 0x5ec   : > { %1096 = shalt.err (!%p1093_p4)
}
 0x5ed   : > { %817 = dma.vmem_to_hbm [thread:$0]  (%p1785_p12), %s1643_s18, 128, %s639_s25, %s626_s10  }
 0x5ee PF: > { %s1786_s13 = sld [smem:[#allocation19_spill]]  ;;  %s1787_s21 = sld [smem:[#allocation26_spill]] }
 0x5ef   : > { %p1789_p7 = scmp.ge.s32.totalorder %s1231_s9, 2 }
 0x5f4   : > { %s653_s27 = sand.u32 1, %s1786_s13   ;;  %p1788_p2 = scmp.ne.s32.totalorder %s1787_s21, 0 }
 0x5f5   : > { %s654_s11 = scalar_lea.sflag [#allocation10], %s653_s27 }
 0x5f6   : > { %p830_p8 = pnand %p1789_p7, %p1788_p2 }
 0x5f8   : > { %1170 = dma.done.wait (!%p830_p8), %s654_s11, 128  }
 0x5f9   : > { %1172 = vsyncadd (!%p830_p8), %s654_s11, 4294967168  ;;  %s26_s9 = sadd.s32 1, %s1231_s9   ;;  %s1791_s7 = sld [smem:[#allocation20_spill]] }
 0x5fa   : > { %p1672_p13 = scmp.ge.s32.totalorder %s26_s9, 4   ;;  %s1792_s18 = smov %s1414_s22 }
 0x5fb   : > { %s1793_s10 = sld [smem:[#allocation25_spill]]  ;;  %s1794_s17 = sld [smem:[#allocation22_spill]] }
 0x5fc   : > { %s1796_s23 = smov %s1183_s24  ;;  %s1797_s24 = smov %s1792_s18 }
 0x5fd   : > { %s1798_s25 = smov %s1191_s26  ;;  %s1799_s26 = smov %s1195_s0 }
 0x5fe   : > { %s1800_s0 = smov %s1539_s14  ;;  %s1801_s27 = smov %s1203_s1 }
 0x5ff   : > { %s1795_s22 = smov %s1791_s7  ;;  %s1802_s1 = smov %s1207_s28 }
 0x600   : > { %s1804_s29 = smov %s1215_s30  ;;  %s1805_s30 = smov %s1219_s6 }
 0x601   : > { %s1803_s28 = smov %s1793_s10  ;;  %s1806_s6 = smov %s1480_s19 }
 0x602   : > { %s1807_s7 = smov %s1227_s8  ;;  %s1808_s8 = smov %s1794_s17 }
 0x603   :  { %25 = sbr.rel (!%p1672_p13) target bundleno = 18 (0x12), region = 113 }
 0x60a   :  { %659 = vsyncpa [#allocation9], 1 }
 0x60b   :  { %661 = vsyncpa [#allocation9 + $0x1], 1 }
 0x60c   :  { %662 = vsyncpa [#allocation12], 1 }
 0x60d   :  { %664 = vsyncpa [#allocation12 + $0x1], 1 }
 0x60e   :  { %665 = vsyncpa [#allocation10], 1 }
 0x60f   :  { %667 = vsyncpa [#allocation10 + $0x1], 1 }

</bundles_post_ra>
